<compile_context>
chip_gen: v7x
topology: tpu7x:2x2x1
jax: 0.10.0
libtpu: 0.0.40
codegen_flags: <defaults>
</compile_context>

<pallas_src>
import jax
import jax.numpy as jnp
from jax.experimental import pallas as pl
from jax.experimental.pallas import tpu as pltpu


def _round_up(x, m):
    return ((x + m - 1) // m) * m


def _ffn_kernel(x_ref, w1_ref, b1_ref, w2_ref, b2_ref, o_ref):
    # x_ref: (tm, Hp) f32 rows; w*: (Hp, Hp) bf16 laid out (in, out); b*: (1, Hp) f32.
    x = x_ref[...]  # keep original f32 tile for the residual path
    h = jnp.dot(x.astype(jnp.bfloat16), w1_ref[...],
                preferred_element_type=jnp.float32)
    # TODO(synk): dropout1/dropout2 are identity in eval mode; training-mode dropout
    # would need pltpu.prng_seed + pltpu.prng_random_bits masking here.
    h = jnp.maximum(h + b1_ref[...], 0.0).astype(jnp.bfloat16)  # bias + ReLU in f32, cast for MXU
    y = jnp.dot(h, w2_ref[...], preferred_element_type=jnp.float32)
    # Fuse bias2 + residual into one VPU pass; residual uses the un-rounded f32 x.
    o_ref[...] = (y + b2_ref[...] + x).astype(o_ref.dtype)


def pointwise_feed_forward(x, w1, b1, w2, b2, *, tm=512):
    """x: (B, L, H) float32. w1, w2: (H, H) laid out as (in, out). b1, b2: (H,)."""
    B, L, H = x.shape
    M = B * L

    # Row tile: multiple of 8 (f32 sublanes); never larger than the (padded) row count.
    tm = max(8, _round_up(min(tm, _round_up(M, 8)), 8))
    Mp = _round_up(M, tm)
    # Lane axis padded to 128 -> lane-dense stores, full MXU tiles.
    Hp = _round_up(H, 128)

    x2d = x.reshape(M, H)
    padded = (Mp != M) or (Hp != H)
    if padded:
        x2d = jnp.pad(x2d, ((0, Mp - M), (0, Hp - H)))

    w1p = jnp.pad(w1, ((0, Hp - H), (0, Hp - H))).astype(jnp.bfloat16)
    w2p = jnp.pad(w2, ((0, Hp - H), (0, Hp - H))).astype(jnp.bfloat16)
    b1p = jnp.pad(b1, (0, Hp - H)).reshape(1, Hp).astype(jnp.float32)
    b2p = jnp.pad(b2, (0, Hp - H)).reshape(1, Hp).astype(jnp.float32)

    grid = (Mp // tm,)

    out2d = pl.pallas_call(
        _ffn_kernel,
        out_shape=jax.ShapeDtypeStruct((Mp, Hp), x.dtype),
        grid_spec=pltpu.PrefetchScalarGridSpec(
            num_scalar_prefetch=0,
            grid=grid,
            in_specs=[
                pl.BlockSpec((tm, Hp), lambda i: (i, 0)),   # x row tile
                pl.BlockSpec((Hp, Hp), lambda i: (0, 0)),   # W1 (in, out), bf16
                pl.BlockSpec((1, Hp), lambda i: (0, 0)),    # b1
                pl.BlockSpec((Hp, Hp), lambda i: (0, 0)),   # W2 (in, out), bf16
                pl.BlockSpec((1, Hp), lambda i: (0, 0)),    # b2
            ],
            out_specs=pl.BlockSpec((tm, Hp), lambda i: (i, 0)),
        ),
        compiler_params=pltpu.CompilerParams(
            dimension_semantics=("parallel",),
        ),
        # Only alias when we built a fresh padded slab (avoids touching caller's x).
        input_output_aliases=({0: 0} if padded else {}),
        cost_estimate=pl.CostEstimate(
            flops=4 * Mp * Hp * Hp,
            transcendentals=0,
            bytes_accessed=(2 * Mp * Hp * 4) + (2 * Hp * Hp * 2) + (2 * Hp * 4),
        ),
    )(x2d, w1p, b1p, w2p, b2p)

    return out2d[:M, :H].reshape(B, L, H)


def init_params(key, hidden_units):
    """Deterministic init mimicking torch.nn.Conv1d default (uniform +-1/sqrt(fan_in)).
    Weights are stored (in, out) so the kernel computes x @ W directly
    (equivalent to PyTorch's x @ W_torch.T with W_torch of shape (out, in, 1))."""
    k1, k2, k3, k4 = jax.random.split(key, 4)
    bound = 1.0 / jnp.sqrt(hidden_units)
    w1 = jax.random.uniform(k1, (hidden_units, hidden_units), jnp.float32, -bound, bound)
    b1 = jax.random.uniform(k2, (hidden_units,), jnp.float32, -bound, bound)
    w2 = jax.random.uniform(k3, (hidden_units, hidden_units), jnp.float32, -bound, bound)
    b2 = jax.random.uniform(k4, (hidden_units,), jnp.float32, -bound, bound)
    return w1, b1, w2, b2


if __name__ == "__main__":
    key = jax.random.PRNGKey(0)
    B, L, H = 2, 8, 32  # batch, seq, hidden_units
    kx, kp = jax.random.split(key)
    x = jax.random.normal(kx, (B, L, H), dtype=jnp.float32)
    w1, b1, w2, b2 = init_params(kp, H)

    out = pointwise_feed_forward(x, w1, b1, w2, b2)
    out = jax.block_until_ready(out)

    # Pure-JAX f32 reference; tolerance accounts for bf16 MXU inputs (f32 accumulate).
    ref = x + (jnp.maximum(x @ w1 + b1, 0.0) @ w2 + b2)
    assert out.shape == ref.shape
    assert jnp.allclose(out, ref, atol=5e-2, rtol=5e-2), "mismatch vs f32 reference"

    print("KERNEL_OK")
</pallas_src>

<mosaic_0001>
module attributes {stable_mosaic.version = 11 : i64} {
  func.func @_ffn_kernel(%arg0: i32, %arg1: memref<16x128xf32, #tpu.memory_space<vmem>>, %arg2: memref<128x128xbf16, #tpu.memory_space<vmem>>, %arg3: memref<1x128xf32, #tpu.memory_space<vmem>>, %arg4: memref<128x128xbf16, #tpu.memory_space<vmem>>, %arg5: memref<1x128xf32, #tpu.memory_space<vmem>>, %arg6: memref<16x128xf32, #tpu.memory_space<vmem>>) attributes {dimension_semantics = [#tpu.dimension_semantics<parallel>], iteration_bounds = array<i64: 1>, scalar_prefetch = 0 : i64, scratch_operands = 0 : i64, tpu.core_type = #tpu.core_type<tc>, window_params = [{transform_indices = @transform_0, window_bounds = array<i64: 16, 128>}, {pipeline_mode = #tpu.pipeline_mode<synchronous>, transform_indices = @transform_1, window_bounds = array<i64: 128, 128>}, {pipeline_mode = #tpu.pipeline_mode<synchronous>, transform_indices = @transform_2, window_bounds = array<i64: 1, 128>}, {pipeline_mode = #tpu.pipeline_mode<synchronous>, transform_indices = @transform_3, window_bounds = array<i64: 128, 128>}, {pipeline_mode = #tpu.pipeline_mode<synchronous>, transform_indices = @transform_4, window_bounds = array<i64: 1, 128>}, {transform_indices = @transform_5, window_bounds = array<i64: 16, 128>}]} {
    %c0 = arith.constant 0 : index
    %c0_0 = arith.constant 0 : index
    %0 = vector.load %arg1[%c0, %c0_0] : memref<16x128xf32, #tpu.memory_space<vmem>>, vector<16x128xf32>
    %1 = arith.truncf %0 : vector<16x128xf32> to vector<16x128xbf16>
    %c0_1 = arith.constant 0 : index
    %c0_2 = arith.constant 0 : index
    %2 = vector.load %arg2[%c0_1, %c0_2] : memref<128x128xbf16, #tpu.memory_space<vmem>>, vector<128x128xbf16>
    %cst = arith.constant dense<0.000000e+00> : vector<16x128xf32>
    %3 = tpu.matmul %1, %2, %cst {dimension_numbers = #tpu.dot_dimension_numbers<[1], [0], [0], [1], [0, 0, 1, 1], [], []>} : vector<16x128xbf16>, vector<128x128xbf16>, vector<16x128xf32> -> vector<16x128xf32>
    %c0_3 = arith.constant 0 : index
    %c0_4 = arith.constant 0 : index
    %4 = vector.load %arg3[%c0_3, %c0_4] : memref<1x128xf32, #tpu.memory_space<vmem>>, vector<1x128xf32>
    %5 = vector.broadcast %4 : vector<1x128xf32> to vector<16x128xf32>
    %6 = arith.addf %3, %5 : vector<16x128xf32>
    %cst_5 = arith.constant 0.000000e+00 : f32
    %7 = vector.broadcast %cst_5 : f32 to vector<16x128xf32>
    %8 = arith.maximumf %6, %7 : vector<16x128xf32>
    %9 = arith.truncf %8 : vector<16x128xf32> to vector<16x128xbf16>
    %c0_6 = arith.constant 0 : index
    %c0_7 = arith.constant 0 : index
    %10 = vector.load %arg4[%c0_6, %c0_7] : memref<128x128xbf16, #tpu.memory_space<vmem>>, vector<128x128xbf16>
    %cst_8 = arith.constant dense<0.000000e+00> : vector<16x128xf32>
    %11 = tpu.matmul %9, %10, %cst_8 {dimension_numbers = #tpu.dot_dimension_numbers<[1], [0], [0], [1], [0, 0, 1, 1], [], []>} : vector<16x128xbf16>, vector<128x128xbf16>, vector<16x128xf32> -> vector<16x128xf32>
    %c0_9 = arith.constant 0 : index
    %c0_10 = arith.constant 0 : index
    %12 = vector.load %arg5[%c0_9, %c0_10] : memref<1x128xf32, #tpu.memory_space<vmem>>, vector<1x128xf32>
    %13 = vector.broadcast %12 : vector<1x128xf32> to vector<16x128xf32>
    %14 = arith.addf %11, %13 : vector<16x128xf32>
    %15 = arith.addf %14, %0 : vector<16x128xf32>
    %c0_11 = arith.constant 0 : index
    %c0_12 = arith.constant 0 : index
    %16 = vector.load %arg6[%c0_11, %c0_12] : memref<16x128xf32, #tpu.memory_space<vmem>>, vector<16x128xf32>
    tpu.vector_store %arg6[%c0_11, %c0_12], %15 {strides = array<i32>} : memref<16x128xf32, #tpu.memory_space<vmem>>, vector<16x128xf32>,
    return
  }
  func.func @transform_0(%arg0: i32) -> (i32, i32) {
    %c0_i32 = arith.constant 0 : i32
    %c0_i32_0 = arith.constant 0 : i32
    return %arg0, %c0_i32 : i32, i32
  }
  func.func @transform_1(%arg0: i32) -> (i32, i32) {
    %c0_i32 = arith.constant 0 : i32
    %c0_i32_0 = arith.constant 0 : i32
    %c0_i32_1 = arith.constant 0 : i32
    return %c0_i32, %c0_i32_0 : i32, i32
  }
  func.func @transform_2(%arg0: i32) -> (i32, i32) {
    %c0_i32 = arith.constant 0 : i32
    %c0_i32_0 = arith.constant 0 : i32
    %c0_i32_1 = arith.constant 0 : i32
    return %c0_i32, %c0_i32_0 : i32, i32
  }
  func.func @transform_3(%arg0: i32) -> (i32, i32) {
    %c0_i32 = arith.constant 0 : i32
    %c0_i32_0 = arith.constant 0 : i32
    %c0_i32_1 = arith.constant 0 : i32
    return %c0_i32, %c0_i32_0 : i32, i32
  }
  func.func @transform_4(%arg0: i32) -> (i32, i32) {
    %c0_i32 = arith.constant 0 : i32
    %c0_i32_0 = arith.constant 0 : i32
    %c0_i32_1 = arith.constant 0 : i32
    return %c0_i32, %c0_i32_0 : i32, i32
  }
  func.func @transform_5(%arg0: i32) -> (i32, i32) {
    %c0_i32 = arith.constant 0 : i32
    %c0_i32_0 = arith.constant 0 : i32
    return %arg0, %c0_i32 : i32, i32
  }
}

</mosaic_0001>

<bundles_post_ra>
// kernel: tpu_custom_call.1
= control target key start
LH: loop header
LB: loop body
LE: loop exit
PB: predicated region body
PF: predicated region fallthrough
CT: control target
= control target key end

     0   :  { %10 = vsyncpa [#allocation3], 0  ;;  %s617_s0 = inlined_call_operand.hbm [shape: f32[16,128], index: 0, kind: input, shape index: {}, may-alias: {0,5}]   ;;  %s618_s1 = inlined_call_operand.hbm [shape: bf16[128,128], index: 1, kind: input, shape index: {}]   ;;  %s619_s2 = inlined_call_operand.vmem [shape: f32[1,128], index: 2, kind: input, shape index: {}]   ;;  %s620_s3 = inlined_call_operand.hbm [shape: bf16[128,128], index: 3, kind: input, shape index: {}]   ;;  %s621_s4 = inlined_call_operand.vmem [shape: f32[1,128], index: 4, kind: input, shape index: {}]   ;;  %s622_s5 = inlined_call_operand.hbm [shape: f32[16,128], index: 5, kind: output, shape index: {}, may-alias: {0,5}]  }
   0x1   :  { %11 = vsyncpa [#allocation6], 0 }
   0x2   :  { %12 = vsyncpa [#allocation4], 0  ;;  %s511_s18 = smov [#allocation5]   ;;  %s417_s22 = scalar_lea.hbm %s618_s1, 1024 }
   0x3   :  { %s30_s19 = sshll.u32 %s511_s18, 4  ;;  %p418_p0 = scmp.ne.s32.totalorder %s618_s1, %s417_s22  ;;  %s31_s19 = int_to_ptr.vmem [resolvable:$true] %s30_s19 }
   0x4   :  { %p421_p1 = scmp.lt.u32.totalorder %s417_s22, %s618_s1 }
   0x6   :  { %p423_p2 = pnand %p421_p1, %p418_p0 }
   0x8   :  { %426 = shalt.err (!%p423_p2)
}
   0x9   :  { %s427_s27 = scalar_lea.vmem %s31_s19, 1024  ;;  %p432_p4 = scmp.lt.s32.totalorder %s31_s19, %s31_s19 }
   0xa   :  { %p428_p3 = scmp.ne.s32.totalorder %s31_s19, %s427_s27  ;;  %p433_p5 = scmp.lt.s32.totalorder %s427_s27, %s427_s27 }
   0xc   :  { %p434_p6 = por %p433_p5, %p432_p4 }
   0xe   :  { %p435_p7 = pnand %p434_p6, %p428_p3 }
  0x10   :  { %438 = shalt.err (!%p435_p7)
}
  0x11   :  { %s512_s28 = smov 64   ;;  %s513_s29 = smov 4  }
  0x12   :  { %36 = dma.hbm_to_vmem [thread:$0]  %s618_s1, 1024, %s31_s19, [#allocation6], %s512_s28, %s512_s28, %s513_s29  }
  0x13   :  { %s514_s7 = smov [#allocation2]   ;;  %s439_s11 = scalar_lea.hbm %s617_s0, 256 }
  0x14   :  { %s18_s8 = sshll.u32 %s514_s7, 4  ;;  %p440_p8 = scmp.ne.s32.totalorder %s617_s0, %s439_s11  ;;  %s19_s8 = int_to_ptr.vmem [resolvable:$true] %s18_s8 }
  0x15   :  { %p443_p9 = scmp.lt.u32.totalorder %s439_s11, %s617_s0 }
  0x17   :  { %p445_p10 = pnand %p443_p9, %p440_p8 }
  0x19   :  { %448 = shalt.err (!%p445_p10)
}
  0x1a   :  { %s449_s16 = scalar_lea.vmem %s19_s8, 256  ;;  %p454_p12 = scmp.lt.s32.totalorder %s19_s8, %s19_s8 }
  0x1b   :  { %p450_p11 = scmp.ne.s32.totalorder %s19_s8, %s449_s16  ;;  %p455_p13 = scmp.lt.s32.totalorder %s449_s16, %s449_s16 }
  0x1d   :  { %p456_p0 = por %p455_p13, %p454_p12 }
  0x1f   :  { %p457_p1 = pnand %p456_p0, %p450_p11 }
  0x21   :  { %460 = shalt.err (!%p457_p1)
}
  0x22   :  { %s515_s1 = smov 128   ;;  %s516_s17 = smov 8  }
  0x23   :  { %24 = dma.hbm_to_vmem [thread:$0]  %s617_s0, 256, %s19_s8, [#allocation3], %s515_s1, %s515_s1, %s516_s17  }
  0x24   :  { %s517_s20 = smov [#allocation7]   ;;  %s461_s24 = scalar_lea.hbm %s620_s3, 1024 }
  0x25   :  { %s44_s21 = sshll.u32 %s517_s20, 4  ;;  %p462_p2 = scmp.ne.s32.totalorder %s620_s3, %s461_s24  ;;  %s45_s21 = int_to_ptr.vmem [resolvable:$true] %s44_s21 }
  0x26   :  { %p465_p3 = scmp.lt.u32.totalorder %s461_s24, %s620_s3 }
  0x28   :  { %p467_p4 = pnand %p465_p3, %p462_p2 }
  0x2a   :  { %470 = shalt.err (!%p467_p4)
}
  0x2b   :  { %s471_s6 = scalar_lea.vmem %s45_s21, 1024  ;;  %p476_p6 = scmp.lt.s32.totalorder %s45_s21, %s45_s21 }
  0x2c   :  { %p472_p5 = scmp.ne.s32.totalorder %s45_s21, %s471_s6  ;;  %p477_p7 = scmp.lt.s32.totalorder %s471_s6, %s471_s6 }
  0x2e   :  { %p478_p8 = por %p477_p7, %p476_p6 }
  0x30   :  { %p479_p9 = pnand %p478_p8, %p472_p5 }
  0x32   :  { %482 = shalt.err (!%p479_p9)
}
  0x33   :  { %50 = dma.hbm_to_vmem [thread:$0]  %s620_s3, 1024, %s45_s21, [#allocation6], %s512_s28, %s512_s28, %s513_s29  }
  0x34   :  { %505 = dma.done.wait [#allocation3], 256  }
  0x35   :  { %506 = vsyncadd [#allocation3], 4294967040 }
  0x36   :  { %507 = dma.done.wait [#allocation6], 2048  }
  0x37   :  { %508 = vsyncadd [#allocation6], 4294965248  ;;  %v518_v0 = vmov 0.0   ;;  %vm519_vm0 = vmmov 0   ;;  %v401_v1 = vld [vmem:[#allocation5] sm:$0xff]   ;;  %v402_v2 = vld [vmem:[#allocation5 + $0x8] sm:$0xff]  }
  0x38   :  { %351 = vmatprep.subr.bf16.mxu0 %v518_v0  ;;  %367 = vmatprep.mubr.msk.bf16.mxu0 %vm519_vm0, %v518_v0  ;;  %v403_v3 = vld [vmem:[#allocation5 + $0x10] sm:$0xff]   ;;  %v409_v4 = vld [vmem:[#allocation7] sm:$0xff]   ;;  %v404_v5 = vld [vmem:[#allocation5 + $0x18] sm:$0xff]   ;;  %s520_s9 = smov [#allocation8]  }
  0x39   :  { %371 = vmatprep.subr.bf16.mxu1 %v518_v0  ;;  %387 = vmatprep.mubr.msk.bf16.mxu1 %vm519_vm0, %v518_v0  ;;  %v410_v6 = vld [vmem:[#allocation7 + $0x8] sm:$0xff]   ;;  %v405_v7 = vld [vmem:[#allocation5 + $0x20] sm:$0xff]   ;;  %v411_v8 = vld [vmem:[#allocation7 + $0x10] sm:$0xff]  }
  0x3a   :  { %352 = vmatpush3.bf16.msra.mxu0 %v401_v1  ;;  %372 = vmatpush3.bf16.msra.mxu1 %v409_v4  ;;  %v406_v9 = vld [vmem:[#allocation5 + $0x28] sm:$0xff]   ;;  %v412_v10 = vld [vmem:[#allocation7 + $0x18] sm:$0xff]   ;;  %v407_v11 = vld [vmem:[#allocation5 + $0x30] sm:$0xff]  }
  0x3b   :  { %353 = vmatprep.subr.bf16.mxu0 %v518_v0  ;;  %373 = vmatprep.subr.bf16.mxu1 %v518_v0  ;;  %v413_v12 = vld [vmem:[#allocation7 + $0x20] sm:$0xff]   ;;  %v408_v13 = vld [vmem:[#allocation5 + $0x38] sm:$0xff]   ;;  %v63_v14 = vld [vmem:[#allocation2] sm:$0xff] }
  0x3c   :  { %v64_v15 = vld [vmem:[#allocation2 + $0x8] sm:$0xff]  ;;  %v414_v16 = vld [vmem:[#allocation7 + $0x28] sm:$0xff]   ;;  %v415_v18 = vld [vmem:[#allocation7 + $0x30] sm:$0xff]  }
  0x3d   :  { %v65_v17 = vpack.c.bf16 %v64_v15, %v63_v14  ;;  %v416_v19 = vld [vmem:[#allocation7 + $0x38] sm:$0xff]   ;;  %v315_v20 = vld [vmem:[%s619_s2] ss:$0 sm:$0xff]  ;;  %s302_s2 = sshll.u32 %s520_s9, 4  ;;  %s303_s2 = int_to_ptr.vmem [resolvable:$true] %s302_s2 }
  0x3e   :  { %354 = vmatpush3.bf16.msra.mxu0 %v402_v2  ;;  %374 = vmatpush3.bf16.msra.mxu1 %v410_v6  ;;  %v324_v30 = vld [vmem:[%s621_s4] ss:$0 sm:$0xff]  ;;  %s483_s10 = scalar_lea.vmem %s303_s2, 256  ;;  %p488_p11 = scmp.lt.s32.totalorder %s303_s2, %s303_s2 }
  0x3f   :  { %355 = vmatprep.subr.bf16.mxu0 %v518_v0  ;;  %375 = vmatprep.subr.bf16.mxu1 %v518_v0  ;;  %p484_p10 = scmp.ne.s32.totalorder %s303_s2, %s483_s10  ;;  %p489_p12 = scmp.lt.s32.totalorder %s483_s10, %s483_s10 }
  0x41   :  { %p490_p13 = por %p489_p12, %p488_p11 }
  0x42   :  { %356 = vmatpush3.bf16.msra.mxu0 %v403_v3  ;;  %376 = vmatpush3.bf16.msra.mxu1 %v411_v8 }
  0x43   :  { %357 = vmatprep.subr.bf16.mxu0 %v518_v0  ;;  %377 = vmatprep.subr.bf16.mxu1 %v518_v0  ;;  %p491_p0 = pnand %p490_p13, %p484_p10 }
  0x46   :  { %358 = vmatpush3.bf16.msra.mxu0 %v404_v5  ;;  %378 = vmatpush3.bf16.msra.mxu1 %v412_v10 }
  0x47   :  { %359 = vmatprep.subr.bf16.mxu0 %v518_v0  ;;  %379 = vmatprep.subr.bf16.mxu1 %v518_v0 }
  0x4a   :  { %360 = vmatpush3.bf16.msra.mxu0 %v405_v7  ;;  %380 = vmatpush3.bf16.msra.mxu1 %v413_v12 }
  0x4b   :  { %361 = vmatprep.subr.bf16.mxu0 %v518_v0  ;;  %381 = vmatprep.subr.bf16.mxu1 %v518_v0 }
  0x4e   :  { %362 = vmatpush3.bf16.msra.mxu0 %v406_v9  ;;  %382 = vmatpush3.bf16.msra.mxu1 %v414_v16 }
  0x4f   :  { %363 = vmatprep.subr.bf16.mxu0 %v518_v0  ;;  %383 = vmatprep.subr.bf16.mxu1 %v518_v0 }
  0x52   :  { %364 = vmatpush3.bf16.msra.mxu0 %v407_v11  ;;  %384 = vmatpush3.bf16.msra.mxu1 %v415_v18 }
  0x53   :  { %365 = vmatprep.subr.bf16.mxu0 %v518_v0  ;;  %385 = vmatprep.subr.bf16.mxu1 %v518_v0 }
  0x56   :  { %366 = vmatpush3.bf16.msra.mxu0 %v408_v13  ;;  %386 = vmatpush3.bf16.msra.mxu1 %v416_v19 }
  0x59   :  { %368 = vmatmul.mubr.bf16.vlgmr.msra.gmra.mrb[0].mxu0 %v65_v17 }
 0x12c   :  { %v171_v21 = vpop.f32.mrb[0].mxu0 }
 0x12d   :  { %v172_v22 = vadd.f32 %v315_v20, %v171_v21  ;;  %v369_v23 = vpop.f32.mrb[1].mxu0 }
 0x12e   :  { %v174_v24 = vpop.f32.mrb[2].mxu0 }
 0x12f   :  { %v175_v25 = vadd.f32 %v315_v20, %v174_v24  ;;  %v370_v26 = vpop.f32.mrb[3].mxu0  ;;  %v178_v27 = vmax.f32 %v172_v22, 0.0 }
 0x131   :  { %v179_v28 = vmax.f32 %v175_v25, 0.0 }
 0x133   :  { %v180_v29 = vpack.c.bf16 %v179_v28, %v178_v27 }
 0x135   :  { %388 = vmatmul.mubr.bf16.vlgmr.msra.gmra.mrb[0].mxu1 %v180_v29 }
 0x208   :  { %v286_v31 = vpop.f32.mrb[0].mxu1 }
 0x209   :  { %v287_v32 = vadd.f32 %v324_v30, %v286_v31  ;;  %v389_v33 = vpop.f32.mrb[1].mxu1 }
 0x20a   :  { %v289_v34 = vpop.f32.mrb[2].mxu1 }
 0x20b   :  { %v293_v35 = vadd.f32 %v287_v32, %v63_v14  ;;  %v290_v36 = vadd.f32 %v324_v30, %v289_v34  ;;  %v390_v37 = vpop.f32.mrb[3].mxu1 }
 0x20d   :  { %295 = vst [vmem:[#allocation8] sm:$0xff] %v293_v35  ;;  %v294_v38 = vadd.f32 %v290_v36, %v64_v15 }
 0x20f   :  { %296 = vst [vmem:[#allocation8 + $0x8] sm:$0xff] %v294_v38 }
 0x210   :  { %494 = shalt.err (!%p491_p0)
}
 0x211   :  { %s495_s12 = scalar_lea.hbm %s622_s5, 256 }
 0x212   :  { %p496_p1 = scmp.ne.s32.totalorder %s622_s5, %s495_s12  ;;  %p499_p2 = scmp.lt.u32.totalorder %s495_s12, %s622_s5 }
 0x214   :  { %p501_p3 = pnand %p499_p2, %p496_p1 }
 0x216   :  { %504 = shalt.err (!%p501_p3)
}
 0x217   :  { %308 = dma.vmem_to_hbm [thread:$0]  %s303_s2, 256, %s622_s5, [#allocation4], %s515_s1, %s515_s1, %s516_s17  }
 0x218   :  { %509 = dma.done.wait [#allocation4], 256  }
 0x219   :  { %510 = vsyncadd [#allocation4], 4294967040 }
 0x21a   :  { %312 = vsyncpa [#allocation3], 1 }
 0x21b   :  { %313 = vsyncpa [#allocation6], 1 }
 0x21c   :  { %314 = vsyncpa [#allocation4], 1 }

</bundles_post_ra>
